<compile_context>
chip_gen: v7x
topology: tpu7x:2x2x1
jax: 0.10.0
libtpu: 0.0.40
codegen_flags: <defaults>
</compile_context>

<pallas_src>
import functools

import jax
import jax.numpy as jnp
from jax import lax
from jax.experimental import pallas as pl
from jax.experimental.pallas import tpu as pltpu


def _reflect_conv_kernel(x_ref, w_ref, b_ref, o_ref, *, KH, KW, stride, Ho, Wo):
    """Fused im2col + conv for one batch item.

    x_ref: (1, stride*stride, Hh, Wh, Cin)  stride-phase-split padded input
    w_ref: (KH*KW, Cin, Cout)               per-tap weight matrices
    b_ref: (1, Cout)                        bias
    o_ref: (1, Cout, Ho*Wo)                 lane-dense output (pixels on lanes)
    """
    Cin = x_ref.shape[-1]
    P = Ho * Wo

    acc = jnp.zeros((P, Cin * 0 + o_ref.shape[1]), dtype=jnp.float32) * 0.0
    acc = jnp.zeros((P, o_ref.shape[1]), dtype=jnp.float32)

    # One small matmul per kernel tap; all slices are static & unit-stride
    # because the wrapper already split the input into stride-phases.
    for kh in range(KH):
        dh = kh // stride
        for kw in range(KW):
            dw = kw // stride
            tap = (kh % stride) * stride + (kw % stride)
            xt = x_ref[0, tap, dh:dh + Ho, dw:dw + Wo, :]      # (Ho, Wo, Cin)
            xt = xt.reshape(P, Cin)                            # collapse leading dims
            wt = w_ref[kh * KW + kw]                           # (Cin, Cout)
            acc = acc + jnp.dot(xt, wt, preferred_element_type=jnp.float32)

    acc = acc + b_ref[...].astype(jnp.float32)                 # (1, Cout) broadcast
    # Single transpose so the store is lane-dense: (Cout, Ho*Wo).
    o_ref[0] = acc.T.astype(o_ref.dtype)


def reflect_conv_forward(x, weight, bias, *, kernel_size=4, stride=2, pad=1):
    """ReflectionPad2d(pad) followed by Conv2d(kernel_size, stride, padding=0).

    x: (N, Cin, H, W); weight: (Cout, Cin, KH, KW); bias: (Cout,).
    Returns (N, Cout, Ho, Wo) -- identical semantics to the PyTorch module.
    """
    N, Cin, H, W = x.shape
    Cout, _, KH, KW = weight.shape

    # 1) Reflection padding (matches torch.nn.ReflectionPad2d; edge not repeated).
    xp = jnp.pad(x, ((0, 0), (0, 0), (pad, pad), (pad, pad)), mode="reflect")
    Hp, Wp = H + 2 * pad, W + 2 * pad
    Ho = (Hp - KH) // stride + 1
    Wo = (Wp - KW) // stride + 1

    # 2) Stride-phase decomposition (single 1x-data re-layout pass) so the
    #    kernel's im2col only needs contiguous, unit-stride slices.
    Hh = pl.cdiv(Hp, stride)
    Wh = pl.cdiv(Wp, stride)
    xp = jnp.pad(xp, ((0, 0), (0, 0),
                      (0, Hh * stride - Hp), (0, Wh * stride - Wp)))
    # (N, Cin, Hh, s, Wh, s) -> (N, s, s, Hh, Wh, Cin) -> (N, s*s, Hh, Wh, Cin)
    xph = xp.reshape(N, Cin, Hh, stride, Wh, stride)
    xph = jnp.transpose(xph, (0, 3, 5, 2, 4, 1))
    xph = xph.reshape(N, stride * stride, Hh, Wh, Cin)

    # 3) Weights: (Cout, Cin, KH, KW) -> (KH*KW, Cin, Cout); bias -> (1, Cout).
    w2 = jnp.transpose(weight, (2, 3, 1, 0)).reshape(KH * KW, Cin, Cout)
    b2 = bias.reshape(1, Cout)

    kernel = functools.partial(_reflect_conv_kernel,
                               KH=KH, KW=KW, stride=stride, Ho=Ho, Wo=Wo)

    out = pl.pallas_call(
        kernel,
        out_shape=jax.ShapeDtypeStruct((N, Cout, Ho * Wo), x.dtype),
        grid_spec=pltpu.PrefetchScalarGridSpec(
            num_scalar_prefetch=0,
            grid=(N,),
            in_specs=[
                pl.BlockSpec((1, stride * stride, Hh, Wh, Cin),
                             lambda n: (n, 0, 0, 0, 0)),
                pl.BlockSpec((KH * KW, Cin, Cout), lambda n: (0, 0, 0)),
                pl.BlockSpec((1, Cout), lambda n: (0, 0)),
            ],
            out_specs=pl.BlockSpec((1, Cout, Ho * Wo), lambda n: (n, 0, 0)),
        ),
        compiler_params=pltpu.CompilerParams(
            dimension_semantics=("parallel",)),
    )(xph, w2, b2)

    # Free reshape: output is already in channel-major (NCHW) order.
    return out.reshape(N, Cout, Ho, Wo)


if __name__ == "__main__":
    key = jax.random.PRNGKey(0)
    kx, kw_key, kb = jax.random.split(key, 3)

    N, Cin, H, W = 2, 4, 16, 16
    Cout, KH, KW = 8, 4, 4
    stride, pad = 2, 1

    x = jax.random.normal(kx, (N, Cin, H, W), dtype=jnp.float32)

    # Deterministic parameter init (same uniform-bound rule as nn.Conv2d).
    fan_in = Cin * KH * KW
    bound = 1.0 / (fan_in ** 0.5)
    weight = jax.random.uniform(kw_key, (Cout, Cin, KH, KW), jnp.float32, -bound, bound)
    bias = jax.random.uniform(kb, (Cout,), jnp.float32, -bound, bound)

    out = jax.block_until_ready(
        reflect_conv_forward(x, weight, bias,
                             kernel_size=KH, stride=stride, pad=pad))

    # Reference check: XLA conv on the same reflect-padded input.
    xp_ref = jnp.pad(x, ((0, 0), (0, 0), (pad, pad), (pad, pad)), mode="reflect")
    ref = lax.conv_general_dilated(
        xp_ref, weight, window_strides=(stride, stride), padding="VALID",
        dimension_numbers=("NCHW", "OIHW", "NCHW")) + bias[None, :, None, None]

    Ho = (H + 2 * pad - KH) // stride + 1
    Wo = (W + 2 * pad - KW) // stride + 1
    assert out.shape == (N, Cout, Ho, Wo)
    assert jnp.allclose(out, ref, atol=1e-4, rtol=1e-4)
    print("KERNEL_OK")
</pallas_src>

<mosaic_0001>
module attributes {stable_mosaic.version = 11 : i64} {
  func.func @_reflect_conv_kernel(%arg0: i32, %arg1: memref<1x4x9x9x4xf32, #tpu.memory_space<vmem>>, %arg2: memref<16x4x8xf32, #tpu.memory_space<vmem>>, %arg3: memref<1x8xf32, #tpu.memory_space<vmem>>, %arg4: memref<1x8x64xf32, #tpu.memory_space<vmem>>) attributes {dimension_semantics = [#tpu.dimension_semantics<parallel>], iteration_bounds = array<i64: 2>, scalar_prefetch = 0 : i64, scratch_operands = 0 : i64, tpu.core_type = #tpu.core_type<tc>, window_params = [{transform_indices = @transform_0, window_bounds = array<i64: 1, 4, 9, 9, 4>}, {pipeline_mode = #tpu.pipeline_mode<synchronous>, transform_indices = @transform_1, window_bounds = array<i64: 16, 4, 8>}, {pipeline_mode = #tpu.pipeline_mode<synchronous>, transform_indices = @transform_2, window_bounds = array<i64: 1, 8>}, {transform_indices = @transform_3, window_bounds = array<i64: 1, 8, 64>}]} {
    %cst = arith.constant 0.000000e+00 : f32
    %0 = vector.broadcast %cst : f32 to vector<64x8xf32>
    %c0 = arith.constant 0 : index
    %c0_0 = arith.constant 0 : index
    %c0_1 = arith.constant 0 : index
    %c0_2 = arith.constant 0 : index
    %c0_3 = arith.constant 0 : index
    %1 = vector.load %arg1[%c0, %c0_0, %c0_1, %c0_2, %c0_3] : memref<1x4x9x9x4xf32, #tpu.memory_space<vmem>>, vector<1x1x8x8x4xf32>
    %2 = vector.shape_cast %1 : vector<1x1x8x8x4xf32> to vector<8x8x4xf32>
    %3 = vector.shape_cast %2 : vector<8x8x4xf32> to vector<64x4xf32>
    %c0_4 = arith.constant 0 : index
    %c0_5 = arith.constant 0 : index
    %c0_6 = arith.constant 0 : index
    %4 = vector.load %arg2[%c0_4, %c0_5, %c0_6] : memref<16x4x8xf32, #tpu.memory_space<vmem>>, vector<1x4x8xf32>
    %5 = vector.shape_cast %4 : vector<1x4x8xf32> to vector<4x8xf32>
    %cst_7 = arith.constant dense<0.000000e+00> : vector<64x8xf32>
    %6 = tpu.matmul %3, %5, %cst_7 {dimension_numbers = #tpu.dot_dimension_numbers<[1], [0], [0], [1], [0, 0, 1, 1], [], []>} : vector<64x4xf32>, vector<4x8xf32>, vector<64x8xf32> -> vector<64x8xf32>
    %7 = arith.addf %0, %6 : vector<64x8xf32>
    %c0_8 = arith.constant 0 : index
    %c1 = arith.constant 1 : index
    %c0_9 = arith.constant 0 : index
    %c0_10 = arith.constant 0 : index
    %c0_11 = arith.constant 0 : index
    %8 = vector.load %arg1[%c0_8, %c1, %c0_9, %c0_10, %c0_11] : memref<1x4x9x9x4xf32, #tpu.memory_space<vmem>>, vector<1x1x8x8x4xf32>
    %9 = vector.shape_cast %8 : vector<1x1x8x8x4xf32> to vector<8x8x4xf32>
    %10 = vector.shape_cast %9 : vector<8x8x4xf32> to vector<64x4xf32>
    %c1_12 = arith.constant 1 : index
    %c0_13 = arith.constant 0 : index
    %c0_14 = arith.constant 0 : index
    %11 = vector.load %arg2[%c1_12, %c0_13, %c0_14] : memref<16x4x8xf32, #tpu.memory_space<vmem>>, vector<1x4x8xf32>
    %12 = vector.shape_cast %11 : vector<1x4x8xf32> to vector<4x8xf32>
    %cst_15 = arith.constant dense<0.000000e+00> : vector<64x8xf32>
    %13 = tpu.matmul %10, %12, %cst_15 {dimension_numbers = #tpu.dot_dimension_numbers<[1], [0], [0], [1], [0, 0, 1, 1], [], []>} : vector<64x4xf32>, vector<4x8xf32>, vector<64x8xf32> -> vector<64x8xf32>
    %14 = arith.addf %7, %13 : vector<64x8xf32>
    %c0_16 = arith.constant 0 : index
    %c0_17 = arith.constant 0 : index
    %c0_18 = arith.constant 0 : index
    %c1_19 = arith.constant 1 : index
    %c0_20 = arith.constant 0 : index
    %15 = vector.load %arg1[%c0_16, %c0_17, %c0_18, %c1_19, %c0_20] : memref<1x4x9x9x4xf32, #tpu.memory_space<vmem>>, vector<1x1x8x8x4xf32>
    %16 = vector.shape_cast %15 : vector<1x1x8x8x4xf32> to vector<8x8x4xf32>
    %17 = vector.shape_cast %16 : vector<8x8x4xf32> to vector<64x4xf32>
    %c2 = arith.constant 2 : index
    %c0_21 = arith.constant 0 : index
    %c0_22 = arith.constant 0 : index
    %18 = vector.load %arg2[%c2, %c0_21, %c0_22] : memref<16x4x8xf32, #tpu.memory_space<vmem>>, vector<1x4x8xf32>
    %19 = vector.shape_cast %18 : vector<1x4x8xf32> to vector<4x8xf32>
    %cst_23 = arith.constant dense<0.000000e+00> : vector<64x8xf32>
    %20 = tpu.matmul %17, %19, %cst_23 {dimension_numbers = #tpu.dot_dimension_numbers<[1], [0], [0], [1], [0, 0, 1, 1], [], []>} : vector<64x4xf32>, vector<4x8xf32>, vector<64x8xf32> -> vector<64x8xf32>
    %21 = arith.addf %14, %20 : vector<64x8xf32>
    %c0_24 = arith.constant 0 : index
    %c1_25 = arith.constant 1 : index
    %c0_26 = arith.constant 0 : index
    %c1_27 = arith.constant 1 : index
    %c0_28 = arith.constant 0 : index
    %22 = vector.load %arg1[%c0_24, %c1_25, %c0_26, %c1_27, %c0_28] : memref<1x4x9x9x4xf32, #tpu.memory_space<vmem>>, vector<1x1x8x8x4xf32>
    %23 = vector.shape_cast %22 : vector<1x1x8x8x4xf32> to vector<8x8x4xf32>
    %24 = vector.shape_cast %23 : vector<8x8x4xf32> to vector<64x4xf32>
    %c3 = arith.constant 3 : index
    %c0_29 = arith.constant 0 : index
    %c0_30 = arith.constant 0 : index
    %25 = vector.load %arg2[%c3, %c0_29, %c0_30] : memref<16x4x8xf32, #tpu.memory_space<vmem>>, vector<1x4x8xf32>
    %26 = vector.shape_cast %25 : vector<1x4x8xf32> to vector<4x8xf32>
    %cst_31 = arith.constant dense<0.000000e+00> : vector<64x8xf32>
    %27 = tpu.matmul %24, %26, %cst_31 {dimension_numbers = #tpu.dot_dimension_numbers<[1], [0], [0], [1], [0, 0, 1, 1], [], []>} : vector<64x4xf32>, vector<4x8xf32>, vector<64x8xf32> -> vector<64x8xf32>
    %28 = arith.addf %21, %27 : vector<64x8xf32>
    %c0_32 = arith.constant 0 : index
    %c2_33 = arith.constant 2 : index
    %c0_34 = arith.constant 0 : index
    %c0_35 = arith.constant 0 : index
    %c0_36 = arith.constant 0 : index
    %29 = vector.load %arg1[%c0_32, %c2_33, %c0_34, %c0_35, %c0_36] : memref<1x4x9x9x4xf32, #tpu.memory_space<vmem>>, vector<1x1x8x8x4xf32>
    %30 = vector.shape_cast %29 : vector<1x1x8x8x4xf32> to vector<8x8x4xf32>
    %31 = vector.shape_cast %30 : vector<8x8x4xf32> to vector<64x4xf32>
    %c4 = arith.constant 4 : index
    %c0_37 = arith.constant 0 : index
    %c0_38 = arith.constant 0 : index
    %32 = vector.load %arg2[%c4, %c0_37, %c0_38] : memref<16x4x8xf32, #tpu.memory_space<vmem>>, vector<1x4x8xf32>
    %33 = vector.shape_cast %32 : vector<1x4x8xf32> to vector<4x8xf32>
    %cst_39 = arith.constant dense<0.000000e+00> : vector<64x8xf32>
    %34 = tpu.matmul %31, %33, %cst_39 {dimension_numbers = #tpu.dot_dimension_numbers<[1], [0], [0], [1], [0, 0, 1, 1], [], []>} : vector<64x4xf32>, vector<4x8xf32>, vector<64x8xf32> -> vector<64x8xf32>
    %35 = arith.addf %28, %34 : vector<64x8xf32>
    %c0_40 = arith.constant 0 : index
    %c3_41 = arith.constant 3 : index
    %c0_42 = arith.constant 0 : index
    %c0_43 = arith.constant 0 : index
    %c0_44 = arith.constant 0 : index
    %36 = vector.load %arg1[%c0_40, %c3_41, %c0_42, %c0_43, %c0_44] : memref<1x4x9x9x4xf32, #tpu.memory_space<vmem>>, vector<1x1x8x8x4xf32>
    %37 = vector.shape_cast %36 : vector<1x1x8x8x4xf32> to vector<8x8x4xf32>
    %38 = vector.shape_cast %37 : vector<8x8x4xf32> to vector<64x4xf32>
    %c5 = arith.constant 5 : index
    %c0_45 = arith.constant 0 : index
    %c0_46 = arith.constant 0 : index
    %39 = vector.load %arg2[%c5, %c0_45, %c0_46] : memref<16x4x8xf32, #tpu.memory_space<vmem>>, vector<1x4x8xf32>
    %40 = vector.shape_cast %39 : vector<1x4x8xf32> to vector<4x8xf32>
    %cst_47 = arith.constant dense<0.000000e+00> : vector<64x8xf32>
    %41 = tpu.matmul %38, %40, %cst_47 {dimension_numbers = #tpu.dot_dimension_numbers<[1], [0], [0], [1], [0, 0, 1, 1], [], []>} : vector<64x4xf32>, vector<4x8xf32>, vector<64x8xf32> -> vector<64x8xf32>
    %42 = arith.addf %35, %41 : vector<64x8xf32>
    %c0_48 = arith.constant 0 : index
    %c2_49 = arith.constant 2 : index
    %c0_50 = arith.constant 0 : index
    %c1_51 = arith.constant 1 : index
    %c0_52 = arith.constant 0 : index
    %43 = vector.load %arg1[%c0_48, %c2_49, %c0_50, %c1_51, %c0_52] : memref<1x4x9x9x4xf32, #tpu.memory_space<vmem>>, vector<1x1x8x8x4xf32>
    %44 = vector.shape_cast %43 : vector<1x1x8x8x4xf32> to vector<8x8x4xf32>
    %45 = vector.shape_cast %44 : vector<8x8x4xf32> to vector<64x4xf32>
    %c6 = arith.constant 6 : index
    %c0_53 = arith.constant 0 : index
    %c0_54 = arith.constant 0 : index
    %46 = vector.load %arg2[%c6, %c0_53, %c0_54] : memref<16x4x8xf32, #tpu.memory_space<vmem>>, vector<1x4x8xf32>
    %47 = vector.shape_cast %46 : vector<1x4x8xf32> to vector<4x8xf32>
    %cst_55 = arith.constant dense<0.000000e+00> : vector<64x8xf32>
    %48 = tpu.matmul %45, %47, %cst_55 {dimension_numbers = #tpu.dot_dimension_numbers<[1], [0], [0], [1], [0, 0, 1, 1], [], []>} : vector<64x4xf32>, vector<4x8xf32>, vector<64x8xf32> -> vector<64x8xf32>
    %49 = arith.addf %42, %48 : vector<64x8xf32>
    %c0_56 = arith.constant 0 : index
    %c3_57 = arith.constant 3 : index
    %c0_58 = arith.constant 0 : index
    %c1_59 = arith.constant 1 : index
    %c0_60 = arith.constant 0 : index
    %50 = vector.load %arg1[%c0_56, %c3_57, %c0_58, %c1_59, %c0_60] : memref<1x4x9x9x4xf32, #tpu.memory_space<vmem>>, vector<1x1x8x8x4xf32>
    %51 = vector.shape_cast %50 : vector<1x1x8x8x4xf32> to vector<8x8x4xf32>
    %52 = vector.shape_cast %51 : vector<8x8x4xf32> to vector<64x4xf32>
    %c7 = arith.constant 7 : index
    %c0_61 = arith.constant 0 : index
    %c0_62 = arith.constant 0 : index
    %53 = vector.load %arg2[%c7, %c0_61, %c0_62] : memref<16x4x8xf32, #tpu.memory_space<vmem>>, vector<1x4x8xf32>
    %54 = vector.shape_cast %53 : vector<1x4x8xf32> to vector<4x8xf32>
    %cst_63 = arith.constant dense<0.000000e+00> : vector<64x8xf32>
    %55 = tpu.matmul %52, %54, %cst_63 {dimension_numbers = #tpu.dot_dimension_numbers<[1], [0], [0], [1], [0, 0, 1, 1], [], []>} : vector<64x4xf32>, vector<4x8xf32>, vector<64x8xf32> -> vector<64x8xf32>
    %56 = arith.addf %49, %55 : vector<64x8xf32>
    %c0_64 = arith.constant 0 : index
    %c0_65 = arith.constant 0 : index
    %c1_66 = arith.constant 1 : index
    %c0_67 = arith.constant 0 : index
    %c0_68 = arith.constant 0 : index
    %57 = vector.load %arg1[%c0_64, %c0_65, %c1_66, %c0_67, %c0_68] : memref<1x4x9x9x4xf32, #tpu.memory_space<vmem>>, vector<1x1x8x8x4xf32>
    %58 = vector.shape_cast %57 : vector<1x1x8x8x4xf32> to vector<8x8x4xf32>
    %59 = vector.shape_cast %58 : vector<8x8x4xf32> to vector<64x4xf32>
    %c8 = arith.constant 8 : index
    %c0_69 = arith.constant 0 : index
    %c0_70 = arith.constant 0 : index
    %60 = vector.load %arg2[%c8, %c0_69, %c0_70] : memref<16x4x8xf32, #tpu.memory_space<vmem>>, vector<1x4x8xf32>
    %61 = vector.shape_cast %60 : vector<1x4x8xf32> to vector<4x8xf32>
    %cst_71 = arith.constant dense<0.000000e+00> : vector<64x8xf32>
    %62 = tpu.matmul %59, %61, %cst_71 {dimension_numbers = #tpu.dot_dimension_numbers<[1], [0], [0], [1], [0, 0, 1, 1], [], []>} : vector<64x4xf32>, vector<4x8xf32>, vector<64x8xf32> -> vector<64x8xf32>
    %63 = arith.addf %56, %62 : vector<64x8xf32>
    %c0_72 = arith.constant 0 : index
    %c1_73 = arith.constant 1 : index
    %c1_74 = arith.constant 1 : index
    %c0_75 = arith.constant 0 : index
    %c0_76 = arith.constant 0 : index
    %64 = vector.load %arg1[%c0_72, %c1_73, %c1_74, %c0_75, %c0_76] : memref<1x4x9x9x4xf32, #tpu.memory_space<vmem>>, vector<1x1x8x8x4xf32>
    %65 = vector.shape_cast %64 : vector<1x1x8x8x4xf32> to vector<8x8x4xf32>
    %66 = vector.shape_cast %65 : vector<8x8x4xf32> to vector<64x4xf32>
    %c9 = arith.constant 9 : index
    %c0_77 = arith.constant 0 : index
    %c0_78 = arith.constant 0 : index
    %67 = vector.load %arg2[%c9, %c0_77, %c0_78] : memref<16x4x8xf32, #tpu.memory_space<vmem>>, vector<1x4x8xf32>
    %68 = vector.shape_cast %67 : vector<1x4x8xf32> to vector<4x8xf32>
    %cst_79 = arith.constant dense<0.000000e+00> : vector<64x8xf32>
    %69 = tpu.matmul %66, %68, %cst_79 {dimension_numbers = #tpu.dot_dimension_numbers<[1], [0], [0], [1], [0, 0, 1, 1], [], []>} : vector<64x4xf32>, vector<4x8xf32>, vector<64x8xf32> -> vector<64x8xf32>
    %70 = arith.addf %63, %69 : vector<64x8xf32>
    %c0_80 = arith.constant 0 : index
    %c0_81 = arith.constant 0 : index
    %c1_82 = arith.constant 1 : index
    %c1_83 = arith.constant 1 : index
    %c0_84 = arith.constant 0 : index
    %71 = vector.load %arg1[%c0_80, %c0_81, %c1_82, %c1_83, %c0_84] : memref<1x4x9x9x4xf32, #tpu.memory_space<vmem>>, vector<1x1x8x8x4xf32>
    %72 = vector.shape_cast %71 : vector<1x1x8x8x4xf32> to vector<8x8x4xf32>
    %73 = vector.shape_cast %72 : vector<8x8x4xf32> to vector<64x4xf32>
    %c10 = arith.constant 10 : index
    %c0_85 = arith.constant 0 : index
    %c0_86 = arith.constant 0 : index
    %74 = vector.load %arg2[%c10, %c0_85, %c0_86] : memref<16x4x8xf32, #tpu.memory_space<vmem>>, vector<1x4x8xf32>
    %75 = vector.shape_cast %74 : vector<1x4x8xf32> to vector<4x8xf32>
    %cst_87 = arith.constant dense<0.000000e+00> : vector<64x8xf32>
    %76 = tpu.matmul %73, %75, %cst_87 {dimension_numbers = #tpu.dot_dimension_numbers<[1], [0], [0], [1], [0, 0, 1, 1], [], []>} : vector<64x4xf32>, vector<4x8xf32>, vector<64x8xf32> -> vector<64x8xf32>
    %77 = arith.addf %70, %76 : vector<64x8xf32>
    %c0_88 = arith.constant 0 : index
    %c1_89 = arith.constant 1 : index
    %c1_90 = arith.constant 1 : index
    %c1_91 = arith.constant 1 : index
    %c0_92 = arith.constant 0 : index
    %78 = vector.load %arg1[%c0_88, %c1_89, %c1_90, %c1_91, %c0_92] : memref<1x4x9x9x4xf32, #tpu.memory_space<vmem>>, vector<1x1x8x8x4xf32>
    %79 = vector.shape_cast %78 : vector<1x1x8x8x4xf32> to vector<8x8x4xf32>
    %80 = vector.shape_cast %79 : vector<8x8x4xf32> to vector<64x4xf32>
    %c11 = arith.constant 11 : index
    %c0_93 = arith.constant 0 : index
    %c0_94 = arith.constant 0 : index
    %81 = vector.load %arg2[%c11, %c0_93, %c0_94] : memref<16x4x8xf32, #tpu.memory_space<vmem>>, vector<1x4x8xf32>
    %82 = vector.shape_cast %81 : vector<1x4x8xf32> to vector<4x8xf32>
    %cst_95 = arith.constant dense<0.000000e+00> : vector<64x8xf32>
    %83 = tpu.matmul %80, %82, %cst_95 {dimension_numbers = #tpu.dot_dimension_numbers<[1], [0], [0], [1], [0, 0, 1, 1], [], []>} : vector<64x4xf32>, vector<4x8xf32>, vector<64x8xf32> -> vector<64x8xf32>
    %84 = arith.addf %77, %83 : vector<64x8xf32>
    %c0_96 = arith.constant 0 : index
    %c2_97 = arith.constant 2 : index
    %c1_98 = arith.constant 1 : index
    %c0_99 = arith.constant 0 : index
    %c0_100 = arith.constant 0 : index
    %85 = vector.load %arg1[%c0_96, %c2_97, %c1_98, %c0_99, %c0_100] : memref<1x4x9x9x4xf32, #tpu.memory_space<vmem>>, vector<1x1x8x8x4xf32>
    %86 = vector.shape_cast %85 : vector<1x1x8x8x4xf32> to vector<8x8x4xf32>
    %87 = vector.shape_cast %86 : vector<8x8x4xf32> to vector<64x4xf32>
    %c12 = arith.constant 12 : index
    %c0_101 = arith.constant 0 : index
    %c0_102 = arith.constant 0 : index
    %88 = vector.load %arg2[%c12, %c0_101, %c0_102] : memref<16x4x8xf32, #tpu.memory_space<vmem>>, vector<1x4x8xf32>
    %89 = vector.shape_cast %88 : vector<1x4x8xf32> to vector<4x8xf32>
    %cst_103 = arith.constant dense<0.000000e+00> : vector<64x8xf32>
    %90 = tpu.matmul %87, %89, %cst_103 {dimension_numbers = #tpu.dot_dimension_numbers<[1], [0], [0], [1], [0, 0, 1, 1], [], []>} : vector<64x4xf32>, vector<4x8xf32>, vector<64x8xf32> -> vector<64x8xf32>
    %91 = arith.addf %84, %90 : vector<64x8xf32>
    %c0_104 = arith.constant 0 : index
    %c3_105 = arith.constant 3 : index
    %c1_106 = arith.constant 1 : index
    %c0_107 = arith.constant 0 : index
    %c0_108 = arith.constant 0 : index
    %92 = vector.load %arg1[%c0_104, %c3_105, %c1_106, %c0_107, %c0_108] : memref<1x4x9x9x4xf32, #tpu.memory_space<vmem>>, vector<1x1x8x8x4xf32>
    %93 = vector.shape_cast %92 : vector<1x1x8x8x4xf32> to vector<8x8x4xf32>
    %94 = vector.shape_cast %93 : vector<8x8x4xf32> to vector<64x4xf32>
    %c13 = arith.constant 13 : index
    %c0_109 = arith.constant 0 : index
    %c0_110 = arith.constant 0 : index
    %95 = vector.load %arg2[%c13, %c0_109, %c0_110] : memref<16x4x8xf32, #tpu.memory_space<vmem>>, vector<1x4x8xf32>
    %96 = vector.shape_cast %95 : vector<1x4x8xf32> to vector<4x8xf32>
    %cst_111 = arith.constant dense<0.000000e+00> : vector<64x8xf32>
    %97 = tpu.matmul %94, %96, %cst_111 {dimension_numbers = #tpu.dot_dimension_numbers<[1], [0], [0], [1], [0, 0, 1, 1], [], []>} : vector<64x4xf32>, vector<4x8xf32>, vector<64x8xf32> -> vector<64x8xf32>
    %98 = arith.addf %91, %97 : vector<64x8xf32>
    %c0_112 = arith.constant 0 : index
    %c2_113 = arith.constant 2 : index
    %c1_114 = arith.constant 1 : index
    %c1_115 = arith.constant 1 : index
    %c0_116 = arith.constant 0 : index
    %99 = vector.load %arg1[%c0_112, %c2_113, %c1_114, %c1_115, %c0_116] : memref<1x4x9x9x4xf32, #tpu.memory_space<vmem>>, vector<1x1x8x8x4xf32>
    %100 = vector.shape_cast %99 : vector<1x1x8x8x4xf32> to vector<8x8x4xf32>
    %101 = vector.shape_cast %100 : vector<8x8x4xf32> to vector<64x4xf32>
    %c14 = arith.constant 14 : index
    %c0_117 = arith.constant 0 : index
    %c0_118 = arith.constant 0 : index
    %102 = vector.load %arg2[%c14, %c0_117, %c0_118] : memref<16x4x8xf32, #tpu.memory_space<vmem>>, vector<1x4x8xf32>
    %103 = vector.shape_cast %102 : vector<1x4x8xf32> to vector<4x8xf32>
    %cst_119 = arith.constant dense<0.000000e+00> : vector<64x8xf32>
    %104 = tpu.matmul %101, %103, %cst_119 {dimension_numbers = #tpu.dot_dimension_numbers<[1], [0], [0], [1], [0, 0, 1, 1], [], []>} : vector<64x4xf32>, vector<4x8xf32>, vector<64x8xf32> -> vector<64x8xf32>
    %105 = arith.addf %98, %104 : vector<64x8xf32>
    %c0_120 = arith.constant 0 : index
    %c3_121 = arith.constant 3 : index
    %c1_122 = arith.constant 1 : index
    %c1_123 = arith.constant 1 : index
    %c0_124 = arith.constant 0 : index
    %106 = vector.load %arg1[%c0_120, %c3_121, %c1_122, %c1_123, %c0_124] : memref<1x4x9x9x4xf32, #tpu.memory_space<vmem>>, vector<1x1x8x8x4xf32>
    %107 = vector.shape_cast %106 : vector<1x1x8x8x4xf32> to vector<8x8x4xf32>
    %108 = vector.shape_cast %107 : vector<8x8x4xf32> to vector<64x4xf32>
    %c15 = arith.constant 15 : index
    %c0_125 = arith.constant 0 : index
    %c0_126 = arith.constant 0 : index
    %109 = vector.load %arg2[%c15, %c0_125, %c0_126] : memref<16x4x8xf32, #tpu.memory_space<vmem>>, vector<1x4x8xf32>
    %110 = vector.shape_cast %109 : vector<1x4x8xf32> to vector<4x8xf32>
    %cst_127 = arith.constant dense<0.000000e+00> : vector<64x8xf32>
    %111 = tpu.matmul %108, %110, %cst_127 {dimension_numbers = #tpu.dot_dimension_numbers<[1], [0], [0], [1], [0, 0, 1, 1], [], []>} : vector<64x4xf32>, vector<4x8xf32>, vector<64x8xf32> -> vector<64x8xf32>
    %112 = arith.addf %105, %111 : vector<64x8xf32>
    %c0_128 = arith.constant 0 : index
    %c0_129 = arith.constant 0 : index
    %113 = vector.load %arg3[%c0_128, %c0_129] : memref<1x8xf32, #tpu.memory_space<vmem>>, vector<1x8xf32>
    %114 = vector.broadcast %113 : vector<1x8xf32> to vector<64x8xf32>
    %115 = arith.addf %112, %114 : vector<64x8xf32>
    %116 = tpu.transpose %115, [1, 0] : vector<64x8xf32> -> vector<8x64xf32>
    %c0_130 = arith.constant 0 : index
    %c0_131 = arith.constant 0 : index
    %c0_132 = arith.constant 0 : index
    %117 = vector.load %arg4[%c0_130, %c0_131, %c0_132] : memref<1x8x64xf32, #tpu.memory_space<vmem>>, vector<1x8x64xf32>
    %118 = vector.shape_cast %117 : vector<1x8x64xf32> to vector<8x64xf32>
    %119 = vector.shape_cast %116 : vector<8x64xf32> to vector<1x8x64xf32>
    tpu.vector_store %arg4[%c0_130, %c0_131, %c0_132], %119 {strides = array<i32>} : memref<1x8x64xf32, #tpu.memory_space<vmem>>, vector<1x8x64xf32>,
    return
  }
  func.func @transform_0(%arg0: i32) -> (i32, i32, i32, i32, i32) {
    %c0_i32 = arith.constant 0 : i32
    %c0_i32_0 = arith.constant 0 : i32
    %c0_i32_1 = arith.constant 0 : i32
    %c0_i32_2 = arith.constant 0 : i32
    %c0_i32_3 = arith.constant 0 : i32
    return %arg0, %c0_i32, %c0_i32_0, %c0_i32_1, %c0_i32_2 : i32, i32, i32, i32, i32
  }
  func.func @transform_1(%arg0: i32) -> (i32, i32, i32) {
    %c0_i32 = arith.constant 0 : i32
    %c0_i32_0 = arith.constant 0 : i32
    %c0_i32_1 = arith.constant 0 : i32
    %c0_i32_2 = arith.constant 0 : i32
    return %c0_i32, %c0_i32_0, %c0_i32_1 : i32, i32, i32
  }
  func.func @transform_2(%arg0: i32) -> (i32, i32) {
    %c0_i32 = arith.constant 0 : i32
    %c0_i32_0 = arith.constant 0 : i32
    %c0_i32_1 = arith.constant 0 : i32
    return %c0_i32, %c0_i32_0 : i32, i32
  }
  func.func @transform_3(%arg0: i32) -> (i32, i32, i32) {
    %c0_i32 = arith.constant 0 : i32
    %c0_i32_0 = arith.constant 0 : i32
    %c0_i32_1 = arith.constant 0 : i32
    return %arg0, %c0_i32, %c0_i32_0 : i32, i32, i32
  }
}

</mosaic_0001>

<bundles_post_ra>
// kernel: tpu_custom_call.1
= control target key start
LH: loop header
LB: loop body
LE: loop exit
PB: predicated region body
PF: predicated region fallthrough
CT: control target
= control target key end

     0   :  { %8 = vsyncpa [#allocation3], 0  ;;  %s3964_s0 = inlined_call_operand.vmem [shape: f32[2,4,9,9,4], index: 0, kind: input, shape index: {}]   ;;  %s3965_s1 = inlined_call_operand.vmem [shape: f32[16,4,8], index: 1, kind: input, shape index: {}]   ;;  %s3966_s2 = inlined_call_operand.vmem [shape: f32[1,8], index: 2, kind: input, shape index: {}]   ;;  %s3967_s3 = inlined_call_operand.hbm [shape: f32[2,8,64], index: 3, kind: output, shape index: {}]  }
   0x1   :  { %10 = vsyncpa [#allocation3 + $0x1], 0  ;;  %s3579_s12 = smov 0   ;;  %s3581_s13 = smov 0  }
   0x2   :  { %s3583_s14 = smov 0   ;;  %s3585_s15 = smov 0  }
   0x3 LB: > { %s3600_s16 = sadd.s32 4294967295, %s3556_s15   ;;  %s2683_s17 = sadd.s32 4294967294, %s3556_s15   ;;  %s3556_s15 = sphi %s3585_s15, %s3973_s15   ;;  %s3552_s14 = sphi %s3583_s14, %s3972_s14   ;;  %s3548_s13 = sphi %s3581_s13, %s3971_s13   ;;  %s3544_s12 = sphi %s3579_s12, %s3970_s12  }
   0x4   : > { %s3604_s18 = sadd.s32 1, %s3556_s15   ;;  %s91_s19 = sadd.s32 1, %s3552_s14 }
   0x5   : > { %s88_s20 = ssub.s32 %s3556_s15, %s3604_s18  ;;  %p101_p0 = scmp.ne.s32.totalorder %s3552_s14, %s3548_s13 }
   0x6   : > { %p89_p1 = scmp.eq.s32.totalorder %s88_s20, 0  ;;  %p102_p2 = scmp.eq.s32.totalorder %s3600_s16, 1 }
   0x7   : > { %p107_p3 = scmp.ne.s32.totalorder %s3548_s13, %s3544_s12  ;;  %p108_p4 = scmp.eq.s32.totalorder %s2683_s17, 1 }
   0x8   : > { %s3615_s21 = scalar_select %p89_p1, %s3552_s14, %s91_s19  }
   0x9   : > { %p3617_p5 = por %p102_p2, %p101_p0  ;;  %p3621_p6 = por %p108_p4, %p107_p3 }
   0xa   : > { %p2686_p7 = scmp.ge.s32.totalorder %s3556_s15, 1  ;;  %p140_p8 = scmp.lt.s32.totalorder %s3556_s15, 3 }
   0xc   : > { %p141_p9 = pnand %p2686_p7, %p140_p8 }
   0xd   : > { %v2697_v0 = vld [vmem:[%s3965_s1 + $0x4] sm:$0xf] (!%p141_p9)  ;;  %vm214_vm0 = vcmask (!%p141_p9), 1043456   ;;  %v2824_v1 = vld [vmem:[%s3965_s1 + $0x20] sm:$0xf] (!%p141_p9)  ;;  %p164_p10 = scmp.lt.s32.totalorder (!%p141_p9), %s3600_s16, 1 }
   0xe   : > { %144 = sbr.rel (%p141_p9) target bundleno = 501 (0x1f5), region = 32  ;;  %3109 = vmatprep.subr.msk.mxu1 (!%p141_p9), %vm214_vm0, %v2697_v0  ;;  %3221 = vmatprep.subr.msk.mxu0 (!%p141_p9), %vm214_vm0, %v2824_v1  ;;  %v177_v2 = vld [vmem:[%s3965_s1] sm:$0xf] (!%p141_p9)  ;;  %v2842_v3 = vld [vmem:[%s3965_s1 + $0x24] sm:$0xf] (!%p141_p9)  ;;  %vm189_vm1 = vcmask (!%p141_p9), 31744  }
   0xf   : > { %3110 = vmatpush3.msk.msra.mxu1 (!%p141_p9), %vm214_vm0, %v2697_v0  ;;  %3222 = vmatpush3.msk.msra.mxu0 (!%p141_p9), %vm214_vm0, %v2824_v1  ;;  %v2716_v10 = vld [vmem:[%s3965_s1 + $0x8] sm:$0xf] (!%p141_p9)  ;;  %v2734_v23 = vld [vmem:[%s3965_s1 + $0xc] sm:$0xf] (!%p141_p9)  ;;  %v2752_v30 = vld [vmem:[%s3965_s1 + $0x10] sm:$0xf] (!%p141_p9) }
  0x10   : > { %3123 = vmatprep.subr.msk.mxu1 (!%p141_p9), %vm214_vm0, %v177_v2  ;;  %3235 = vmatprep.subr.msk.mxu0 (!%p141_p9), %vm214_vm0, %v2842_v3  ;;  %v2860_v11 = vld [vmem:[%s3965_s1 + $0x28] sm:$0xf] (!%p141_p9)  ;;  %v2878_v24 = vld [vmem:[%s3965_s1 + $0x2c] sm:$0xf] (!%p141_p9)  ;;  %v2896_v31 = vld [vmem:[%s3965_s1 + $0x30] sm:$0xf] (!%p141_p9) }
  0x11   : > { %v2770_v41 = vld [vmem:[%s3965_s1 + $0x14] sm:$0xf] (!%p141_p9)  ;;  %v2788_v52 = vld [vmem:[%s3965_s1 + $0x18] sm:$0xf] (!%p141_p9)  ;;  %v2806_v63 = vld [vmem:[%s3965_s1 + $0x1c] sm:$0xf] (!%p141_p9) }
  0x12   : > { %v2914_v42 = vld [vmem:[%s3965_s1 + $0x34] sm:$0xf] (!%p141_p9)  ;;  %v2932_v53 = vld [vmem:[%s3965_s1 + $0x38] sm:$0xf] (!%p141_p9)  ;;  %v2950_v0 = vld [vmem:[%s3965_s1 + $0x3c] sm:$0xf] (!%p141_p9) }
  0x13   : > { %s2962_s29 = sshll.u32 (!%p141_p9), %s3600_s16, 7  ;;  %vm2608_vm2 = vcmask (!%p141_p9), 523264  }
  0x14   : > { %s3922_s7 = scalar_lea.hbm (!%p141_p9), %s3967_s3, %s2962_s29 }
  0x15   : > { %s165_s5 = scalar_select %p164_p10, %s3600_s16, 1 }
  0x16   : > { %s3558_s16 = smov [#allocation2]  }
  0x17   : > { %s3453_s6 = smul.u32 576, %s165_s5  ;;  %s3498_s11 = sshll.u32 %s3558_s16, 4  ;;  %s3499_s11 = int_to_ptr.vmem [resolvable:$false] %s3498_s11 }
  0x18   : > { %s3500_s17 = scalar_lea.vmem %s3499_s11, 256 }
  0x19   : > { %s3650_s9 = scalar_lea.vmem %s3964_s0, %s3453_s6 }
  0x1a   : > { %v2689_v4 = vld [vmem:[%s3650_s9 + $0x90] sm:$0xff]  ;;  %v2690_v6 = vld [vmem:[%s3650_s9 + $0xa0] sm:$0xff] }
  0x1b   : > { %v2816_v5 = vld [vmem:[%s3650_s9 + $0x10] sm:$0xff]  ;;  %3111 = vmatprep.mubr.msk.f32.mxu1 %vm189_vm1, %v2689_v4  ;;  %v2817_v7 = vld [vmem:[%s3650_s9 + $0x20] sm:$0xff] }
  0x1c   : > { %3223 = vmatprep.mubr.msk.f32.mxu0 %vm189_vm1, %v2816_v5  ;;  %v2691_v8 = vld [vmem:[%s3650_s9 + $0xb0] sm:$0xff]  ;;  %3112 = vmatmul.mubr.msk.f32.vlgmr.msra.gmra.mrb[0].mxu1 %vm189_vm1, %v2690_v6  ;;  %v2692_v12 = vld [vmem:[%s3650_s9 + $0xc0] sm:$0xff] }
  0x1d   : > { %v2818_v9 = vld [vmem:[%s3650_s9 + $0x30] sm:$0xff]  ;;  %3224 = vmatmul.mubr.msk.f32.vlgmr.msra.gmra.mrb[0].mxu0 %vm189_vm1, %v2817_v7  ;;  %3124 = vmatpush3.msk.msra.mxu1 %vm214_vm0, %v177_v2  ;;  %v2819_v13 = vld [vmem:[%s3650_s9 + $0x40] sm:$0xff] }
  0x1e   : > { %3236 = vmatpush3.msk.msra.mxu0 %vm214_vm0, %v2842_v3  ;;  %3114 = vmatprep.mubr.msk.f32.mxu1 %vm189_vm1, %v2691_v8  ;;  %v2693_v14 = vld [vmem:[%s3650_s9 + $0xd0] sm:$0xff]  ;;  %v2694_v16 = vld [vmem:[%s3650_s9 + $0xe0] sm:$0xff] }
  0x1f   : > { %3226 = vmatprep.mubr.msk.f32.mxu0 %vm189_vm1, %v2818_v9  ;;  %v2820_v15 = vld [vmem:[%s3650_s9 + $0x50] sm:$0xff]  ;;  %3137 = vmatprep.subr.msk.mxu1 %vm214_vm0, %v2716_v10  ;;  %v2821_v17 = vld [vmem:[%s3650_s9 + $0x60] sm:$0xff] }
  0x20   : > { %3249 = vmatprep.subr.msk.mxu0 %vm214_vm0, %v2860_v11  ;;  %3115 = vmatmul.mubr.msk.f32.gmra.mrb[2].mxu1 %vm189_vm1, %v2692_v12  ;;  %v2695_v18 = vld [vmem:[%s3650_s9 + $0xf0] sm:$0xff]  ;;  %v2696_v20 = vld [vmem:[%s3650_s9 + $0x100] sm:$0xff] }
  0x21   : > { %3227 = vmatmul.mubr.msk.f32.gmra.mrb[2].mxu0 %vm189_vm1, %v2819_v13  ;;  %3117 = vmatprep.mubr.msk.f32.mxu1 %vm189_vm1, %v2693_v14  ;;  %v2822_v19 = vld [vmem:[%s3650_s9 + $0x70] sm:$0xff]  ;;  %v2823_v21 = vld [vmem:[%s3650_s9 + $0x80] sm:$0xff] }
  0x22   : > { %3229 = vmatprep.mubr.msk.f32.mxu0 %vm189_vm1, %v2820_v15  ;;  %v169_v22 = vld [vmem:[%s3650_s9] sm:$0xff]  ;;  %v2841_v25 = vld [vmem:[%s3650_s9 + $0x110] sm:$0xff] }
  0x23   : > { %v455_v26 = vld [vmem:[%s3650_s9 + $0x1] sm:$0xff]  ;;  %v2852_v27 = vld [vmem:[%s3650_s9 + $0x11] sm:$0xff] }
  0x24   : > { %3118 = vmatmul.mubr.msk.f32.gmra.mrb[4].mxu1 %vm189_vm1, %v2694_v16  ;;  %v2853_v28 = vld [vmem:[%s3650_s9 + $0x21] sm:$0xff]  ;;  %v2854_v29 = vld [vmem:[%s3650_s9 + $0x31] sm:$0xff] }
  0x25   : > { %3230 = vmatmul.mubr.msk.f32.gmra.mrb[4].mxu0 %vm189_vm1, %v2821_v17  ;;  %3120 = vmatprep.mubr.msk.f32.mxu1 %vm189_vm1, %v2695_v18  ;;  %v2855_v32 = vld [vmem:[%s3650_s9 + $0x41] sm:$0xff]  ;;  %v2856_v33 = vld [vmem:[%s3650_s9 + $0x51] sm:$0xff] }
  0x26   : > { %3232 = vmatprep.mubr.msk.f32.mxu0 %vm189_vm1, %v2822_v19  ;;  %v2857_v34 = vld [vmem:[%s3650_s9 + $0x61] sm:$0xff]  ;;  %v2858_v35 = vld [vmem:[%s3650_s9 + $0x71] sm:$0xff] }
  0x27   : > { %v2859_v36 = vld [vmem:[%s3650_s9 + $0x81] sm:$0xff]  ;;  %v2726_v37 = vld [vmem:[%s3650_s9 + $0x91] sm:$0xff] }
  0x28   : > { %3121 = vmatmul.mubr.msk.f32.gmra.mrb[6].mxu1 %vm189_vm1, %v2696_v20  ;;  %v2870_v38 = vld [vmem:[%s3650_s9 + $0xa1] sm:$0xff]  ;;  %v2871_v39 = vld [vmem:[%s3650_s9 + $0xb1] sm:$0xff] }
  0x29   : > { %3233 = vmatmul.mubr.msk.f32.gmra.mrb[6].mxu0 %vm189_vm1, %v2823_v21  ;;  %3125 = vmatprep.mubr.msk.f32.mxu1 %vm189_vm1, %v169_v22  ;;  %v2872_v40 = vld [vmem:[%s3650_s9 + $0xc1] sm:$0xff]  ;;  %v2873_v43 = vld [vmem:[%s3650_s9 + $0xd1] sm:$0xff] }
  0x2a   : > { %3237 = vmatprep.mubr.msk.f32.mxu0 %vm189_vm1, %v2690_v6  ;;  %v2874_v44 = vld [vmem:[%s3650_s9 + $0xe1] sm:$0xff]  ;;  %v2875_v45 = vld [vmem:[%s3650_s9 + $0xf1] sm:$0xff] }
  0x2b   : > { %v2876_v46 = vld [vmem:[%s3650_s9 + $0x101] sm:$0xff]  ;;  %v2877_v47 = vld [vmem:[%s3650_s9 + $0x111] sm:$0xff] }
  0x2c   : > { %3126 = vmatmul.mubr.msk.f32.vlgmr.msra.gmra.mrb[0].mxu1 %vm189_vm1, %v2816_v5  ;;  %v2744_v48 = vld [vmem:[%s3650_s9 + $0x120] sm:$0xff]  ;;  %v2888_v49 = vld [vmem:[%s3650_s9 + $0x130] sm:$0xff] }
  0x2d   : > { %3238 = vmatmul.mubr.msk.f32.vlgmr.msra.gmra.mrb[0].mxu0 %vm189_vm1, %v2691_v8  ;;  %3138 = vmatpush3.msk.msra.mxu1 %vm214_vm0, %v2716_v10  ;;  %v2889_v50 = vld [vmem:[%s3650_s9 + $0x140] sm:$0xff]  ;;  %v2890_v51 = vld [vmem:[%s3650_s9 + $0x150] sm:$0xff] }
  0x2e   : > { %3250 = vmatpush3.msk.msra.mxu0 %vm214_vm0, %v2860_v11  ;;  %3128 = vmatprep.mubr.msk.f32.mxu1 %vm189_vm1, %v2817_v7  ;;  %v2891_v54 = vld [vmem:[%s3650_s9 + $0x160] sm:$0xff]  ;;  %v2892_v55 = vld [vmem:[%s3650_s9 + $0x170] sm:$0xff] }
  0x2f   : > { %3240 = vmatprep.mubr.msk.f32.mxu0 %vm189_vm1, %v2692_v12  ;;  %3151 = vmatprep.subr.msk.mxu1 %vm214_vm0, %v2734_v23  ;;  %v2893_v56 = vld [vmem:[%s3650_s9 + $0x180] sm:$0xff]  ;;  %v2894_v57 = vld [vmem:[%s3650_s9 + $0x190] sm:$0xff] }
  0x30   : > { %3263 = vmatprep.subr.msk.mxu0 %vm214_vm0, %v2878_v24  ;;  %3129 = vmatmul.mubr.msk.f32.gmra.mrb[2].mxu1 %vm189_vm1, %v2818_v9  ;;  %v2895_v58 = vld [vmem:[%s3650_s9 + $0x1a0] sm:$0xff]  ;;  %v2762_v59 = vld [vmem:[%s3650_s9 + $0x1b0] sm:$0xff] }
  0x31   : > { %3241 = vmatmul.mubr.msk.f32.gmra.mrb[2].mxu0 %vm189_vm1, %v2693_v14  ;;  %3131 = vmatprep.mubr.msk.f32.mxu1 %vm189_vm1, %v2819_v13  ;;  %v2906_v60 = vld [vmem:[%s3650_s9 + $0x1c0] sm:$0xff]  ;;  %v2907_v61 = vld [vmem:[%s3650_s9 + $0x1d0] sm:$0xff] }
  0x32   : > { %3243 = vmatprep.mubr.msk.f32.mxu0 %vm189_vm1, %v2694_v16  ;;  %v2908_v62 = vld [vmem:[%s3650_s9 + $0x1e0] sm:$0xff]  ;;  %v2909_v1 = vld [vmem:[%s3650_s9 + $0x1f0] sm:$0xff] }
  0x33   : > { %v2910_v2 = vld [vmem:[%s3650_s9 + $0x200] sm:$0xff]  ;;  %v2911_v3 = vld [vmem:[%s3650_s9 + $0x210] sm:$0xff] }
  0x34   : > { %3132 = vmatmul.mubr.msk.f32.gmra.mrb[4].mxu1 %vm189_vm1, %v2820_v15  ;;  %v2912_v4 = vld [vmem:[%s3650_s9 + $0x220] sm:$0xff]  ;;  %v2913_v5 = vld [vmem:[%s3650_s9 + $0x230] sm:$0xff] }
  0x35   : > { %3244 = vmatmul.mubr.msk.f32.gmra.mrb[4].mxu0 %vm189_vm1, %v2695_v18  ;;  %3134 = vmatprep.mubr.msk.f32.mxu1 %vm189_vm1, %v2821_v17  ;;  %v2780_v6 = vld [vmem:[%s3650_s9 + $0x121] sm:$0xff]  ;;  %v2924_v7 = vld [vmem:[%s3650_s9 + $0x131] sm:$0xff] }
  0x36   : > { %3246 = vmatprep.mubr.msk.f32.mxu0 %vm189_vm1, %v2696_v20  ;;  %v2925_v8 = vld [vmem:[%s3650_s9 + $0x141] sm:$0xff]  ;;  %v2926_v9 = vld [vmem:[%s3650_s9 + $0x151] sm:$0xff] }
  0x37   : > { %v2927_v10 = vld [vmem:[%s3650_s9 + $0x161] sm:$0xff]  ;;  %v2928_v11 = vld [vmem:[%s3650_s9 + $0x171] sm:$0xff] }
  0x38   : > { %3135 = vmatmul.mubr.msk.f32.gmra.mrb[6].mxu1 %vm189_vm1, %v2822_v19  ;;  %v2929_v12 = vld [vmem:[%s3650_s9 + $0x181] sm:$0xff]  ;;  %v2930_v13 = vld [vmem:[%s3650_s9 + $0x191] sm:$0xff] }
  0x39   : > { %3247 = vmatmul.mubr.msk.f32.gmra.mrb[6].mxu0 %vm189_vm1, %v2841_v25  ;;  %3139 = vmatprep.mubr.msk.f32.mxu1 %vm189_vm1, %v455_v26  ;;  %v2931_v14 = vld [vmem:[%s3650_s9 + $0x1a1] sm:$0xff]  ;;  %v2798_v15 = vld [vmem:[%s3650_s9 + $0x1b1] sm:$0xff] }
  0x3a   : > { %3251 = vmatprep.mubr.msk.f32.mxu0 %vm189_vm1, %v2852_v27  ;;  %v2942_v16 = vld [vmem:[%s3650_s9 + $0x1c1] sm:$0xff]  ;;  %v2943_v17 = vld [vmem:[%s3650_s9 + $0x1d1] sm:$0xff] }
  0x3b   : > { %v2944_v18 = vld [vmem:[%s3650_s9 + $0x1e1] sm:$0xff]  ;;  %v2945_v19 = vld [vmem:[%s3650_s9 + $0x1f1] sm:$0xff] }
  0x3c   : > { %3140 = vmatmul.mubr.msk.f32.vlgmr.msra.gmra.mrb[0].mxu1 %vm189_vm1, %v2852_v27  ;;  %v2946_v20 = vld [vmem:[%s3650_s9 + $0x201] sm:$0xff]  ;;  %v2947_v21 = vld [vmem:[%s3650_s9 + $0x211] sm:$0xff] }
  0x3d   : > { %3252 = vmatmul.mubr.msk.f32.vlgmr.msra.gmra.mrb[0].mxu0 %vm189_vm1, %v2853_v28  ;;  %3152 = vmatpush3.msk.msra.mxu1 %vm214_vm0, %v2734_v23  ;;  %v2948_v22 = vld [vmem:[%s3650_s9 + $0x221] sm:$0xff]  ;;  %v2949_v23 = vld [vmem:[%s3650_s9 + $0x231] sm:$0xff]  ;;  %s161_s9 = sand.u32 1, %s3548_s13  }
  0x3e   : > { %3264 = vmatpush3.msk.msra.mxu0 %vm214_vm0, %v2878_v24  ;;  %3142 = vmatprep.mubr.msk.f32.mxu1 %vm189_vm1, %v2853_v28  ;;  %s2687_s28 = sshll.u32 %s161_s9, 3  ;;  %s2611_s8 = scalar_lea.sflag [#allocation3], %s161_s9 }
  0x3f   : > { %3254 = vmatprep.mubr.msk.f32.mxu0 %vm189_vm1, %v2854_v29  ;;  %3165 = vmatprep.subr.msk.mxu1 %vm214_vm0, %v2752_v30  ;;  %s163_s30 = scalar_lea.vmem [#allocation2], %s2687_s28 }
  0x40   : > { %3277 = vmatprep.subr.msk.mxu0 %vm214_vm0, %v2896_v31  ;;  %3143 = vmatmul.mubr.msk.f32.gmra.mrb[2].mxu1 %vm189_vm1, %v2854_v29  ;;  %v2960_v29 = vld [vmem:[%s3966_s2] ss:$0 sm:$0xff]  ;;  %s2624_s4 = sshll.u32 %s163_s30, 4  ;;  %s3924_s4 = int_to_ptr.vmem [resolvable:$true] %s2624_s4 }
  0x41   : > { %3255 = vmatmul.mubr.msk.f32.gmra.mrb[2].mxu0 %vm189_vm1, %v2855_v32  ;;  %3145 = vmatprep.mubr.msk.f32.mxu1 %vm189_vm1, %v2855_v32  ;;  %s3494_s10 = scalar_lea.vmem %s3924_s4, 128  ;;  %p3501_p0 = scmp.lt.s32.totalorder %s3924_s4, %s3499_s11 }
  0x42   : > { %3257 = vmatprep.mubr.msk.f32.mxu0 %vm189_vm1, %v2856_v33  ;;  %p3495_p11 = scmp.ne.s32.totalorder %s3924_s4, %s3494_s10  ;;  %p3502_p1 = scmp.lt.s32.totalorder %s3500_s17, %s3494_s10 }
  0x44   : > { %3146 = vmatmul.mubr.msk.f32.gmra.mrb[4].mxu1 %vm189_vm1, %v2856_v33  ;;  %p3496_p12 = pnand %p3495_p11, %p3617_p5  ;;  %p3503_p2 = por %p3502_p1, %p3501_p0 }
  0x45   : > { %3258 = vmatmul.mubr.msk.f32.gmra.mrb[4].mxu0 %vm189_vm1, %v2857_v34  ;;  %3148 = vmatprep.mubr.msk.f32.mxu1 %vm189_vm1, %v2857_v34 }
  0x46   : > { %3260 = vmatprep.mubr.msk.f32.mxu0 %vm189_vm1, %v2858_v35  ;;  %p3497_p13 = pneg %p3496_p12 }
  0x48   : > { %3149 = vmatmul.mubr.msk.f32.gmra.mrb[6].mxu1 %vm189_vm1, %v2858_v35  ;;  %p3504_p3 = pnand %p3503_p2, %p3497_p13 }
  0x49   : > { %3261 = vmatmul.mubr.msk.f32.gmra.mrb[6].mxu0 %vm189_vm1, %v2859_v36  ;;  %3153 = vmatprep.mubr.msk.f32.mxu1 %vm189_vm1, %v2726_v37 }
  0x4a   : > { %3265 = vmatprep.mubr.msk.f32.mxu0 %vm189_vm1, %v2870_v38 }
  0x4c   : > { %3154 = vmatmul.mubr.msk.f32.vlgmr.msra.gmra.mrb[0].mxu1 %vm189_vm1, %v2870_v38 }
  0x4d   : > { %3266 = vmatmul.mubr.msk.f32.vlgmr.msra.gmra.mrb[0].mxu0 %vm189_vm1, %v2871_v39  ;;  %3166 = vmatpush3.msk.msra.mxu1 %vm214_vm0, %v2752_v30 }
  0x4e   : > { %3278 = vmatpush3.msk.msra.mxu0 %vm214_vm0, %v2896_v31  ;;  %3156 = vmatprep.mubr.msk.f32.mxu1 %vm189_vm1, %v2871_v39 }
  0x4f   : > { %3268 = vmatprep.mubr.msk.f32.mxu0 %vm189_vm1, %v2872_v40  ;;  %3179 = vmatprep.subr.msk.mxu1 %vm214_vm0, %v2770_v41 }
  0x50   : > { %3291 = vmatprep.subr.msk.mxu0 %vm214_vm0, %v2914_v42  ;;  %3157 = vmatmul.mubr.msk.f32.gmra.mrb[2].mxu1 %vm189_vm1, %v2872_v40 }
  0x51   : > { %3269 = vmatmul.mubr.msk.f32.gmra.mrb[2].mxu0 %vm189_vm1, %v2873_v43  ;;  %3159 = vmatprep.mubr.msk.f32.mxu1 %vm189_vm1, %v2873_v43 }
  0x52   : > { %3271 = vmatprep.mubr.msk.f32.mxu0 %vm189_vm1, %v2874_v44 }
  0x54   : > { %3160 = vmatmul.mubr.msk.f32.gmra.mrb[4].mxu1 %vm189_vm1, %v2874_v44 }
  0x55   : > { %3272 = vmatmul.mubr.msk.f32.gmra.mrb[4].mxu0 %vm189_vm1, %v2875_v45  ;;  %3162 = vmatprep.mubr.msk.f32.mxu1 %vm189_vm1, %v2875_v45 }
  0x56   : > { %3274 = vmatprep.mubr.msk.f32.mxu0 %vm189_vm1, %v2876_v46 }
  0x58   : > { %3163 = vmatmul.mubr.msk.f32.gmra.mrb[6].mxu1 %vm189_vm1, %v2876_v46 }
  0x59   : > { %3275 = vmatmul.mubr.msk.f32.gmra.mrb[6].mxu0 %vm189_vm1, %v2877_v47  ;;  %3167 = vmatprep.mubr.msk.f32.mxu1 %vm189_vm1, %v2744_v48 }
  0x5a   : > { %3279 = vmatprep.mubr.msk.f32.mxu0 %vm189_vm1, %v2888_v49 }
  0x5c   : > { %3168 = vmatmul.mubr.msk.f32.vlgmr.msra.gmra.mrb[0].mxu1 %vm189_vm1, %v2888_v49 }
  0x5d   : > { %3280 = vmatmul.mubr.msk.f32.vlgmr.msra.gmra.mrb[0].mxu0 %vm189_vm1, %v2889_v50  ;;  %3180 = vmatpush3.msk.msra.mxu1 %vm214_vm0, %v2770_v41 }
  0x5e   : > { %3292 = vmatpush3.msk.msra.mxu0 %vm214_vm0, %v2914_v42  ;;  %3170 = vmatprep.mubr.msk.f32.mxu1 %vm189_vm1, %v2889_v50 }
  0x5f   : > { %3282 = vmatprep.mubr.msk.f32.mxu0 %vm189_vm1, %v2890_v51  ;;  %3193 = vmatprep.subr.msk.mxu1 %vm214_vm0, %v2788_v52 }
  0x60   : > { %3305 = vmatprep.subr.msk.mxu0 %vm214_vm0, %v2932_v53  ;;  %3171 = vmatmul.mubr.msk.f32.gmra.mrb[2].mxu1 %vm189_vm1, %v2890_v51 }
  0x61   : > { %3283 = vmatmul.mubr.msk.f32.gmra.mrb[2].mxu0 %vm189_vm1, %v2891_v54  ;;  %3173 = vmatprep.mubr.msk.f32.mxu1 %vm189_vm1, %v2891_v54 }
  0x62   : > { %3285 = vmatprep.mubr.msk.f32.mxu0 %vm189_vm1, %v2892_v55 }
  0x64   : > { %3174 = vmatmul.mubr.msk.f32.gmra.mrb[4].mxu1 %vm189_vm1, %v2892_v55 }
  0x65   : > { %3286 = vmatmul.mubr.msk.f32.gmra.mrb[4].mxu0 %vm189_vm1, %v2893_v56  ;;  %3176 = vmatprep.mubr.msk.f32.mxu1 %vm189_vm1, %v2893_v56 }
  0x66   : > { %3288 = vmatprep.mubr.msk.f32.mxu0 %vm189_vm1, %v2894_v57 }
  0x68   : > { %3177 = vmatmul.mubr.msk.f32.gmra.mrb[6].mxu1 %vm189_vm1, %v2894_v57 }
  0x69   : > { %3289 = vmatmul.mubr.msk.f32.gmra.mrb[6].mxu0 %vm189_vm1, %v2895_v58  ;;  %3181 = vmatprep.mubr.msk.f32.mxu1 %vm189_vm1, %v2762_v59 }
  0x6a   : > { %3293 = vmatprep.mubr.msk.f32.mxu0 %vm189_vm1, %v2906_v60 }
  0x6c   : > { %3182 = vmatmul.mubr.msk.f32.vlgmr.msra.gmra.mrb[0].mxu1 %vm189_vm1, %v2906_v60 }
  0x6d   : > { %3294 = vmatmul.mubr.msk.f32.vlgmr.msra.gmra.mrb[0].mxu0 %vm189_vm1, %v2907_v61  ;;  %3194 = vmatpush3.msk.msra.mxu1 %vm214_vm0, %v2788_v52 }
  0x6e   : > { %3306 = vmatpush3.msk.msra.mxu0 %vm214_vm0, %v2932_v53  ;;  %3184 = vmatprep.mubr.msk.f32.mxu1 %vm189_vm1, %v2907_v61 }
  0x6f   : > { %3296 = vmatprep.mubr.msk.f32.mxu0 %vm189_vm1, %v2908_v62  ;;  %3207 = vmatprep.subr.msk.mxu1 %vm214_vm0, %v2806_v63 }
  0x70   : > { %3319 = vmatprep.subr.msk.mxu0 %vm214_vm0, %v2950_v0  ;;  %3185 = vmatmul.mubr.msk.f32.gmra.mrb[2].mxu1 %vm189_vm1, %v2908_v62 }
  0x71   : > { %3297 = vmatmul.mubr.msk.f32.gmra.mrb[2].mxu0 %vm189_vm1, %v2909_v1  ;;  %3187 = vmatprep.mubr.msk.f32.mxu1 %vm189_vm1, %v2909_v1 }
  0x72   : > { %3299 = vmatprep.mubr.msk.f32.mxu0 %vm189_vm1, %v2910_v2 }
  0x74   : > { %3188 = vmatmul.mubr.msk.f32.gmra.mrb[4].mxu1 %vm189_vm1, %v2910_v2 }
  0x75   : > { %3300 = vmatmul.mubr.msk.f32.gmra.mrb[4].mxu0 %vm189_vm1, %v2911_v3  ;;  %3190 = vmatprep.mubr.msk.f32.mxu1 %vm189_vm1, %v2911_v3 }
  0x76   : > { %3302 = vmatprep.mubr.msk.f32.mxu0 %vm189_vm1, %v2912_v4 }
  0x78   : > { %3191 = vmatmul.mubr.msk.f32.gmra.mrb[6].mxu1 %vm189_vm1, %v2912_v4 }
  0x79   : > { %3303 = vmatmul.mubr.msk.f32.gmra.mrb[6].mxu0 %vm189_vm1, %v2913_v5  ;;  %3195 = vmatprep.mubr.msk.f32.mxu1 %vm189_vm1, %v2780_v6 }
  0x7a   : > { %3307 = vmatprep.mubr.msk.f32.mxu0 %vm189_vm1, %v2924_v7 }
  0x7c   : > { %3196 = vmatmul.mubr.msk.f32.vlgmr.msra.gmra.mrb[0].mxu1 %vm189_vm1, %v2924_v7 }
  0x7d   : > { %3308 = vmatmul.mubr.msk.f32.vlgmr.msra.gmra.mrb[0].mxu0 %vm189_vm1, %v2925_v8  ;;  %3208 = vmatpush3.msk.msra.mxu1 %vm214_vm0, %v2806_v63 }
  0x7e   : > { %3320 = vmatpush3.msk.msra.mxu0 %vm214_vm0, %v2950_v0  ;;  %3198 = vmatprep.mubr.msk.f32.mxu1 %vm189_vm1, %v2925_v8 }
  0x7f   : > { %3310 = vmatprep.mubr.msk.f32.mxu0 %vm189_vm1, %v2926_v9 }
  0x80   : > { %3199 = vmatmul.mubr.msk.f32.gmra.mrb[2].mxu1 %vm189_vm1, %v2926_v9 }
  0x81   : > { %3311 = vmatmul.mubr.msk.f32.gmra.mrb[2].mxu0 %vm189_vm1, %v2927_v10  ;;  %3201 = vmatprep.mubr.msk.f32.mxu1 %vm189_vm1, %v2927_v10 }
  0x82   : > { %3313 = vmatprep.mubr.msk.f32.mxu0 %vm189_vm1, %v2928_v11 }
  0x84   : > { %3202 = vmatmul.mubr.msk.f32.gmra.mrb[4].mxu1 %vm189_vm1, %v2928_v11 }
  0x85   : > { %3314 = vmatmul.mubr.msk.f32.gmra.mrb[4].mxu0 %vm189_vm1, %v2929_v12  ;;  %3204 = vmatprep.mubr.msk.f32.mxu1 %vm189_vm1, %v2929_v12 }
  0x86   : > { %3316 = vmatprep.mubr.msk.f32.mxu0 %vm189_vm1, %v2930_v13 }
  0x88   : > { %3205 = vmatmul.mubr.msk.f32.gmra.mrb[6].mxu1 %vm189_vm1, %v2930_v13 }
  0x89   : > { %3317 = vmatmul.mubr.msk.f32.gmra.mrb[6].mxu0 %vm189_vm1, %v2931_v14  ;;  %3209 = vmatprep.mubr.msk.f32.mxu1 %vm189_vm1, %v2798_v15 }
  0x8a   : > { %3321 = vmatprep.mubr.msk.f32.mxu0 %vm189_vm1, %v2942_v16 }
  0x8c   : > { %3210 = vmatmul.mubr.msk.f32.vlgmr.msra.gmra.mrb[0].mxu1 %vm189_vm1, %v2942_v16 }
  0x8d   : > { %3322 = vmatmul.mubr.msk.f32.vlgmr.msra.gmra.mrb[0].mxu0 %vm189_vm1, %v2943_v17  ;;  %3212 = vmatprep.mubr.msk.f32.mxu1 %vm189_vm1, %v2943_v17 }
  0x8e   : > { %3324 = vmatprep.mubr.msk.f32.mxu0 %vm189_vm1, %v2944_v18 }
  0x90   : > { %3213 = vmatmul.mubr.msk.f32.gmra.mrb[2].mxu1 %vm189_vm1, %v2944_v18 }
  0x91   : > { %3325 = vmatmul.mubr.msk.f32.gmra.mrb[2].mxu0 %vm189_vm1, %v2945_v19  ;;  %3215 = vmatprep.mubr.msk.f32.mxu1 %vm189_vm1, %v2945_v19 }
  0x92   : > { %3327 = vmatprep.mubr.msk.f32.mxu0 %vm189_vm1, %v2946_v20 }
  0x94   : > { %3216 = vmatmul.mubr.msk.f32.gmra.mrb[4].mxu1 %vm189_vm1, %v2946_v20 }
  0x95   : > { %3328 = vmatmul.mubr.msk.f32.gmra.mrb[4].mxu0 %vm189_vm1, %v2947_v21  ;;  %3218 = vmatprep.mubr.msk.f32.mxu1 %vm189_vm1, %v2947_v21 }
  0x96   : > { %3330 = vmatprep.mubr.msk.f32.mxu0 %vm189_vm1, %v2948_v22 }
  0x98   : > { %3219 = vmatmul.mubr.msk.f32.gmra.mrb[6].mxu1 %vm189_vm1, %v2948_v22 }
  0x99   : > { %3331 = vmatmul.mubr.msk.f32.gmra.mrb[6].mxu0 %vm189_vm1, %v2949_v23 }
 0x15f   : > { %v3211_v24 = vpop.f32.mrb[0].mxu1 }
 0x160   : > { %v3323_v25 = vpop.f32.mrb[0].mxu0  ;;  %v1310_v27 = vpop.f32.mrb[1].mxu1 }
 0x161   : > { %v3333_v26 = vadd.f32 %v3323_v25, %v3211_v24  ;;  %v2514_v28 = vpop.f32.mrb[1].mxu0 }
 0x162   : > { %v3334_v30 = vadd.f32 %v2514_v28, %v1310_v27 }
 0x163   : > { %v3214_v31 = vpop.f32.mrb[2].mxu1  ;;  %v2569_v40 = vadd.f32 %v3333_v26, %v2960_v29 }
 0x164   : > { %v3326_v32 = vpop.f32.mrb[2].mxu0  ;;  %v2568_v33 = vadd.f32 %v3334_v30, %v2960_v29  ;;  %v1320_v35 = vpop.f32.mrb[3].mxu1 }
 0x165   : > { %v3335_v34 = vadd.f32 %v3326_v32, %v3214_v31  ;;  %v2524_v36 = vpop.f32.mrb[3].mxu0 }
 0x166   : > { %v3336_v37 = vadd.f32 %v2524_v36, %v1320_v35  ;;  %2576 = vxpose.xlu0.b32.start [1/8] (short) (narrow) %v2568_v33, 8 }
 0x167   : > { %v3217_v38 = vpop.f32.mrb[4].mxu1  ;;  %v2571_v52 = vadd.f32 %v3335_v34, %v2960_v29 }
 0x168   : > { %v3329_v39 = vpop.f32.mrb[4].mxu0  ;;  %v1330_v42 = vpop.f32.mrb[5].mxu1  ;;  %v2570_v47 = vadd.f32 %v3336_v37, %v2960_v29 }
 0x169   : > { %v3337_v41 = vadd.f32 %v3329_v39, %v3217_v38  ;;  %v2534_v43 = vpop.f32.mrb[5].mxu0 }
 0x16a   : > { %v3338_v44 = vadd.f32 %v2534_v43, %v1330_v42  ;;  %2577 = vxpose.xlu0.b32.cont [2/8] (short) (narrow) %v2569_v40, 8 }
 0x16b   : > { %v3220_v45 = vpop.f32.mrb[6].mxu1  ;;  %v2573_v54 = vadd.f32 %v3337_v41, %v2960_v29 }
 0x16c   : > { %v3332_v46 = vpop.f32.mrb[6].mxu0  ;;  %v1340_v49 = vpop.f32.mrb[7].mxu1  ;;  %v2572_v53 = vadd.f32 %v3338_v44, %v2960_v29 }
 0x16d   : > { %v3339_v48 = vadd.f32 %v3332_v46, %v3220_v45  ;;  %v2544_v50 = vpop.f32.mrb[7].mxu0 }
 0x16e   : > { %v3340_v51 = vadd.f32 %v2544_v50, %v1340_v49  ;;  %2578 = vxpose.xlu0.b32.cont [3/8] (short) (narrow) %v2570_v47, 8 }
 0x16f   : > { %v2575_v56 = vadd.f32 %v3339_v48, %v2960_v29 }
 0x170   : > { %v2574_v55 = vadd.f32 %v3340_v51, %v2960_v29 }
 0x172   : > { %2579 = vxpose.xlu0.b32.cont [4/8] (short) (narrow) %v2571_v52, 8 }
 0x176   : > { %2580 = vxpose.xlu0.b32.cont [5/8] (short) (narrow) %v2572_v53, 8 }
 0x17a   : > { %2581 = vxpose.xlu0.b32.cont [6/8] (short) (narrow) %v2573_v54, 8 }
 0x17e   : > { %2582 = vxpose.xlu0.b32.cont [7/8] (short) (narrow) %v2574_v55, 8 }
 0x182   : > { %2583 = vxpose.xlu0.b32.end [8/8] (short) (narrow) %v2575_v56, 8 }
 0x1e6   : > { %v2592_v57 = vpop.trf.xlu0 }
 0x1e7   : > { %2609 = vst.msk [vmem:[%s163_s30] sm:$0xff] %vm2608_vm2, %v2592_v57 }
 0x1e8   : > { %3507 = shalt.err (!%p3504_p3)
}
 0x1e9   : > { %s3508_s19 = scalar_lea.hbm %s3922_s7, 128  ;;  %s3512_s25 = scalar_lea.hbm %s3967_s3, 256 }
 0x1ea   : > { %p3509_p4 = scmp.ne.s32.totalorder %s3922_s7, %s3508_s19  ;;  %p3513_p9 = scmp.lt.u32.totalorder %s3922_s7, %s3967_s3 }
 0x1eb   : > { %p3514_p10 = scmp.lt.u32.totalorder %s3512_s25, %s3508_s19  ;;  %p3516_p12 = scmp.lt.u32.totalorder %s3508_s19, %s3922_s7 }
 0x1ec   : > { %p3510_p7 = pnand %p3509_p4, %p3617_p5 }
 0x1ed   : > { %p3515_p11 = por %p3514_p10, %p3513_p9 }
 0x1ee   : > { %p3511_p8 = pneg %p3510_p7 }
 0x1ef   : > { %p3517_p13 = por %p3516_p12, %p3515_p11 }
 0x1f1   : > { %p3518_p0 = pnand %p3517_p13, %p3511_p8 }
 0x1f3   : > { %3521 = shalt.err (!%p3518_p0)
}
 0x1f4   : > { %3454 = dma.vmem_to_hbm [thread:$0]  (%p3617_p5), %s3924_s4, 128, %s3922_s7, %s2611_s8  }
 0x1f5 PF: > { %p3460_p1 = scmp.ge.s32.totalorder %s3556_s15, 2  ;;  %s2636_s9 = sand.u32 1, %s3544_s12  }
 0x1f6   : > { %s2637_s28 = scalar_lea.sflag [#allocation3], %s2636_s9 }
 0x1f7   : > { %p3457_p2 = pnand %p3460_p1, %p3621_p6 }
 0x1f9   : > { %3539 = dma.done.wait (!%p3457_p2), %s2637_s28, 128  }
 0x1fa   : > { %3541 = vsyncadd (!%p3457_p2), %s2637_s28, 4294967168  ;;  %p13_p3 = scmp.ge.s32.totalorder %s3604_s18, 4   ;;  %s3970_s12 = smov %s3548_s13 }
 0x1fb   : > { %s3971_s13 = smov %s3552_s14  ;;  %s3972_s14 = smov %s3615_s21 }
 0x1fc   : > { %s3973_s15 = smov %s3604_s18  ;;  %15 = sbr.rel (!%p13_p3) target bundleno = 3 (0x3), region = 89 }
 0x203   :  { %2642 = vsyncpa [#allocation3], 1 }
 0x204   :  { %2644 = vsyncpa [#allocation3 + $0x1], 1 }

</bundles_post_ra>
